<compile_context>
chip_gen: v6e
topology: v6e:2x2x1
jax: 0.10.0
libtpu: 0.0.40
codegen_flags: <defaults>
</compile_context>

<pallas_src>
import functools

import numpy as np
import jax
import jax.numpy as jnp
from jax.experimental import pallas as pl
from jax.experimental.pallas import tpu as pltpu


# ---------------------------------------------------------------------------
# Random stripe parameters (mirrors torch.randint sampling in DropStripes)
# ---------------------------------------------------------------------------
def sample_stripe_params(key, batch, total_width, drop_width, stripes_num):
    """Returns (bgns, lens), each int32 of shape (batch, stripes_num).

    lens ~ U[0, drop_width) ; bgns ~ U[0, total_width - lens)
    (same distributions as torch.randint in DropStripes.transform_slice; the exact
     torch RNG stream itself is not reproducible in JAX).
    """
    if drop_width > total_width:
        raise ValueError(
            f"drop_width ({drop_width}) must be <= total_width ({total_width})")
    k_len, k_bgn = jax.random.split(key)
    lens = jax.random.randint(k_len, (batch, stripes_num), 0, drop_width,
                              dtype=jnp.int32)
    bgns = jax.random.randint(k_bgn, (batch, stripes_num), 0, total_width - lens,
                              dtype=jnp.int32)
    return bgns, lens


# ---------------------------------------------------------------------------
# Pallas kernel: out = where(keep_mask(time stripes, freq stripes), x, 0)
# ---------------------------------------------------------------------------
def _specaug_kernel(t_bgn_ref, t_end_ref, f_bgn_ref, f_end_ref,
                    x_ref, o_ref, *, time_stripes, freq_stripes, fold, freq_bins):
    b = pl.program_id(0)
    x = x_ref[...]                               # block: (1, C, R_tile, L)
    R, L = x.shape[-2], x.shape[-1]
    r0 = pl.program_id(1) * R                    # folded-row offset of this block

    if fold == 1:
        # F >= 128 (or unfoldable): time index depends only on rows, freq only on lanes
        # -> fully separable mask (tiny iotas, one broadcast AND).
        t_idx = r0 + jax.lax.broadcasted_iota(jnp.int32, (R, 1), 0)       # (R, 1)
        f_idx = jax.lax.broadcasted_iota(jnp.int32, (1, L), 1)            # (1, L)
    else:
        # Lane-folded layout: lane = sub * F + f with t = (r0 + row) * fold + sub.
        shift = freq_bins.bit_length() - 1                                # log2(F)
        row = jax.lax.broadcasted_iota(jnp.int32, (R, L), 0)
        lane = jax.lax.broadcasted_iota(jnp.int32, (R, L), 1)
        t_idx = (r0 + row) * fold + (lane >> shift)                       # (R, L)
        lane1 = jax.lax.broadcasted_iota(jnp.int32, (1, L), 1)
        f_idx = lane1 & (freq_bins - 1)                                   # (1, L)

    keep_t = jnp.ones(t_idx.shape, dtype=jnp.bool_)
    keep_f = jnp.ones(f_idx.shape, dtype=jnp.bool_)
    # stripes_num is small and static -> unrolled Python loops (scalar SMEM reads)
    for s in range(time_stripes):
        bgn = t_bgn_ref[b * time_stripes + s]
        end = t_end_ref[b * time_stripes + s]
        keep_t = keep_t & ((t_idx < bgn) | (t_idx >= end))
    for s in range(freq_stripes):
        bgn = f_bgn_ref[b * freq_stripes + s]
        end = f_end_ref[b * freq_stripes + s]
        keep_f = keep_f & ((f_idx < bgn) | (f_idx >= end))

    keep = (keep_t & keep_f)[None, None, :, :]   # (1, 1, R, L), broadcast over C
    o_ref[...] = jnp.where(keep, x, jnp.zeros_like(x))


def _choose_row_tile(R, C, L, itemsize, target_bytes=2 * 1024 * 1024):
    """Largest divisor of R that is a multiple of 8 (or R itself) with block<=target."""
    candidates = [d for d in range(1, R + 1)
                  if R % d == 0 and (d % 8 == 0 or d == R)]
    fitting = [d for d in candidates if C * d * L * itemsize <= target_bytes]
    return max(fitting) if fitting else min(candidates)


def drop_stripes_pallas(x, t_bgn, t_len, f_bgn, f_len):
    """x: (B, C, T, F); stripe params: int32 (B, n_stripes). Returns masked x."""
    B, C, T, F_ = x.shape
    time_stripes = int(t_bgn.shape[1])
    freq_stripes = int(f_bgn.shape[1])

    # Flattened 1-D stripe scalars (SMEM pads 1-D arrays only to next pow2).
    t_bgn1 = t_bgn.reshape(-1).astype(jnp.int32)
    t_end1 = (t_bgn + t_len).reshape(-1).astype(jnp.int32)
    f_bgn1 = f_bgn.reshape(-1).astype(jnp.int32)
    f_end1 = (f_bgn + f_len).reshape(-1).astype(jnp.int32)

    # Lane-density fix for F < 128: fold k = 128//F time rows into the lane dim.
    fold = 1
    if F_ < 128 and 128 % F_ == 0 and T % (128 // F_) == 0:
        fold = 128 // F_
    R, L = T // fold, F_ * fold
    xv = x.reshape(B, C, R, L) if fold > 1 else x

    itemsize = x.dtype.itemsize
    row_tile = _choose_row_tile(R, C, L, itemsize)

    kernel = functools.partial(_specaug_kernel,
                               time_stripes=time_stripes,
                               freq_stripes=freq_stripes,
                               fold=fold,
                               freq_bins=F_)

    out = pl.pallas_call(
        kernel,
        out_shape=jax.ShapeDtypeStruct(xv.shape, xv.dtype),
        grid_spec=pltpu.PrefetchScalarGridSpec(
            num_scalar_prefetch=4,               # stripe scalars live in SMEM
            grid=(B, R // row_tile),
            in_specs=[
                pl.BlockSpec((1, C, row_tile, L), lambda b, r, *_: (b, 0, r, 0)),
            ],
            out_specs=pl.BlockSpec((1, C, row_tile, L), lambda b, r, *_: (b, 0, r, 0)),
        ),
        # index 4 = xv among (t_bgn, t_end, f_bgn, f_end, xv): write in place.
        input_output_aliases={4: 0},
        compiler_params=pltpu.CompilerParams(
            dimension_semantics=("parallel", "parallel")),
        cost_estimate=pl.CostEstimate(
            flops=B * C * T * F_,
            transcendentals=0,
            bytes_accessed=2 * x.size * itemsize),
    )(t_bgn1, t_end1, f_bgn1, f_end1, xv)

    return out.reshape(B, C, T, F_) if fold > 1 else out


def spec_augmentation(x, key, *, time_drop_width, time_stripes_num,
                      freq_drop_width, freq_stripes_num, training=True):
    """Functional equivalent of SpecAugmentation.forward."""
    if not training:
        return x
    B, C, T, F_ = x.shape
    kt, kf = jax.random.split(key)
    t_bgn, t_len = sample_stripe_params(kt, B, T, time_drop_width, time_stripes_num)
    f_bgn, f_len = sample_stripe_params(kf, B, F_, freq_drop_width, freq_stripes_num)
    return drop_stripes_pallas(x, t_bgn, t_len, f_bgn, f_len)


def _numpy_reference(x_np, t_bgn, t_len, f_bgn, f_len):
    ref = x_np.copy()
    tb, tl = np.asarray(t_bgn), np.asarray(t_len)
    fb, fl = np.asarray(f_bgn), np.asarray(f_len)
    B = x_np.shape[0]
    for n in range(B):
        for s in range(tb.shape[1]):
            ref[n, :, tb[n, s]:tb[n, s] + tl[n, s], :] = 0.0
        for s in range(fb.shape[1]):
            ref[n, :, :, fb[n, s]:fb[n, s] + fl[n, s]] = 0.0
    return ref


if __name__ == "__main__":
    key = jax.random.PRNGKey(0)

    # ------------------------------------------------------------------
    # Test 1: F < 128 -> lane-folded path (F=16 folds 8 time rows -> 128 lanes)
    # ------------------------------------------------------------------
    B, C, T, F_ = 2, 4, 32, 16
    time_drop_width, time_stripes_num = 8, 2
    freq_drop_width, freq_stripes_num = 4, 2

    kx, kt, kf, k2 = jax.random.split(key, 4)
    x = jax.random.normal(kx, (B, C, T, F_), dtype=jnp.float32)
    x_np = np.asarray(x)  # snapshot before the (aliased) kernel call

    t_bgn, t_len = sample_stripe_params(kt, B, T, time_drop_width, time_stripes_num)
    f_bgn, f_len = sample_stripe_params(kf, B, F_, freq_drop_width, freq_stripes_num)

    out = jax.block_until_ready(drop_stripes_pallas(x, t_bgn, t_len, f_bgn, f_len))
    assert out.shape == (B, C, T, F_)
    np.testing.assert_allclose(np.asarray(out),
                               _numpy_reference(x_np, t_bgn, t_len, f_bgn, f_len),
                               rtol=0, atol=0)

    # ------------------------------------------------------------------
    # Test 2: non-foldable F -> fold == 1 (fully separable mask) path
    # ------------------------------------------------------------------
    B2, C2, T2, F2 = 2, 2, 16, 200
    kx2, kt2, kf2 = jax.random.split(k2, 3)
    x2 = jax.random.normal(kx2, (B2, C2, T2, F2), dtype=jnp.float32)
    x2_np = np.asarray(x2)
    t_bgn2, t_len2 = sample_stripe_params(kt2, B2, T2, 6, 2)
    f_bgn2, f_len2 = sample_stripe_params(kf2, B2, F2, 20, 2)
    out2 = jax.block_until_ready(
        drop_stripes_pallas(x2, t_bgn2, t_len2, f_bgn2, f_len2))
    np.testing.assert_allclose(np.asarray(out2),
                               _numpy_reference(x2_np, t_bgn2, t_len2, f_bgn2, f_len2),
                               rtol=0, atol=0)

    # ------------------------------------------------------------------
    # eval-mode path is identity; also exercise the high-level training path
    # ------------------------------------------------------------------
    out_eval = spec_augmentation(
        x, key, time_drop_width=time_drop_width, time_stripes_num=time_stripes_num,
        freq_drop_width=freq_drop_width, freq_stripes_num=freq_stripes_num,
        training=False)
    np.testing.assert_allclose(np.asarray(out_eval), x_np)

    out_train = spec_augmentation(
        x, key, time_drop_width=time_drop_width, time_stripes_num=time_stripes_num,
        freq_drop_width=freq_drop_width, freq_stripes_num=freq_stripes_num,
        training=True)
    jax.block_until_ready(out_train)

    print("KERNEL_OK")
</pallas_src>

<mosaic_0001>
module attributes {stable_mosaic.version = 11 : i64} {
  func.func @_specaug_kernel(%arg0: i32, %arg1: i32, %arg2: memref<4xi32, #tpu.memory_space<smem>>, %arg3: memref<4xi32, #tpu.memory_space<smem>>, %arg4: memref<4xi32, #tpu.memory_space<smem>>, %arg5: memref<4xi32, #tpu.memory_space<smem>>, %arg6: memref<1x4x4x128xf32, #tpu.memory_space<vmem>>, %arg7: memref<1x4x4x128xf32, #tpu.memory_space<vmem>>) attributes {dimension_semantics = [#tpu.dimension_semantics<parallel>, #tpu.dimension_semantics<parallel>], iteration_bounds = array<i64: 2, 1>, scalar_prefetch = 4 : i64, scratch_operands = 0 : i64, tpu.core_type = #tpu.core_type<tc>, window_params = [{transform_indices = @transform_0, window_bounds = array<i64: 1, 4, 4, 128>}, {transform_indices = @transform_1, window_bounds = array<i64: 1, 4, 4, 128>}]} {
    %c0 = arith.constant 0 : index
    %c0_0 = arith.constant 0 : index
    %c0_1 = arith.constant 0 : index
    %c0_2 = arith.constant 0 : index
    %0 = vector.load %arg6[%c0, %c0_0, %c0_1, %c0_2] : memref<1x4x4x128xf32, #tpu.memory_space<vmem>>, vector<1x4x4x128xf32>
    %c4_i32 = arith.constant 4 : i32
    %1 = arith.muli %arg1, %c4_i32 : i32
    %2 = tpu.iota {dimensions = array<i32: 0>} : vector<4x128xi32>
    %3 = tpu.iota {dimensions = array<i32: 1>} : vector<4x128xi32>
    %4 = vector.broadcast %1 : i32 to vector<4x128xi32>
    %5 = arith.addi %4, %2 : vector<4x128xi32>
    %c8_i32 = arith.constant 8 : i32
    %6 = vector.broadcast %c8_i32 : i32 to vector<4x128xi32>
    %7 = arith.muli %5, %6 : vector<4x128xi32>
    %c4_i32_3 = arith.constant 4 : i32
    %8 = vector.broadcast %c4_i32_3 : i32 to vector<4x128xi32>
    %9 = arith.shrsi %3, %8 : vector<4x128xi32>
    %10 = arith.addi %7, %9 : vector<4x128xi32>
    %11 = tpu.iota {dimensions = array<i32: 1>} : vector<1x128xi32>
    %c15_i32 = arith.constant 15 : i32
    %12 = vector.broadcast %c15_i32 : i32 to vector<1x128xi32>
    %13 = arith.andi %11, %12 : vector<1x128xi32>
    %true = arith.constant true
    %14 = vector.broadcast %true : i1 to vector<4x128xi1>
    %true_4 = arith.constant true
    %15 = vector.broadcast %true_4 : i1 to vector<1x128xi1>
    %c2_i32 = arith.constant 2 : i32
    %16 = arith.muli %arg0, %c2_i32 : i32
    %c0_i32 = arith.constant 0 : i32
    %17 = arith.addi %16, %c0_i32 : i32
    %18 = arith.index_cast %17 : i32 to index
    %19 = memref.load %arg2[%18] : memref<4xi32, #tpu.memory_space<smem>>
    %c2_i32_5 = arith.constant 2 : i32
    %20 = arith.muli %arg0, %c2_i32_5 : i32
    %c0_i32_6 = arith.constant 0 : i32
    %21 = arith.addi %20, %c0_i32_6 : i32
    %22 = arith.index_cast %21 : i32 to index
    %23 = memref.load %arg3[%22] : memref<4xi32, #tpu.memory_space<smem>>
    %24 = vector.broadcast %19 : i32 to vector<4x128xi32>
    %25 = arith.cmpi slt, %10, %24 : vector<4x128xi32>
    %26 = vector.broadcast %23 : i32 to vector<4x128xi32>
    %27 = arith.cmpi sge, %10, %26 : vector<4x128xi32>
    %28 = arith.ori %25, %27 : vector<4x128xi1>
    %29 = arith.andi %14, %28 : vector<4x128xi1>
    %c2_i32_7 = arith.constant 2 : i32
    %30 = arith.muli %arg0, %c2_i32_7 : i32
    %c1_i32 = arith.constant 1 : i32
    %31 = arith.addi %30, %c1_i32 : i32
    %32 = arith.index_cast %31 : i32 to index
    %33 = memref.load %arg2[%32] : memref<4xi32, #tpu.memory_space<smem>>
    %c2_i32_8 = arith.constant 2 : i32
    %34 = arith.muli %arg0, %c2_i32_8 : i32
    %c1_i32_9 = arith.constant 1 : i32
    %35 = arith.addi %34, %c1_i32_9 : i32
    %36 = arith.index_cast %35 : i32 to index
    %37 = memref.load %arg3[%36] : memref<4xi32, #tpu.memory_space<smem>>
    %38 = vector.broadcast %33 : i32 to vector<4x128xi32>
    %39 = arith.cmpi slt, %10, %38 : vector<4x128xi32>
    %40 = vector.broadcast %37 : i32 to vector<4x128xi32>
    %41 = arith.cmpi sge, %10, %40 : vector<4x128xi32>
    %42 = arith.ori %39, %41 : vector<4x128xi1>
    %43 = arith.andi %29, %42 : vector<4x128xi1>
    %c2_i32_10 = arith.constant 2 : i32
    %44 = arith.muli %arg0, %c2_i32_10 : i32
    %c0_i32_11 = arith.constant 0 : i32
    %45 = arith.addi %44, %c0_i32_11 : i32
    %46 = arith.index_cast %45 : i32 to index
    %47 = memref.load %arg4[%46] : memref<4xi32, #tpu.memory_space<smem>>
    %c2_i32_12 = arith.constant 2 : i32
    %48 = arith.muli %arg0, %c2_i32_12 : i32
    %c0_i32_13 = arith.constant 0 : i32
    %49 = arith.addi %48, %c0_i32_13 : i32
    %50 = arith.index_cast %49 : i32 to index
    %51 = memref.load %arg5[%50] : memref<4xi32, #tpu.memory_space<smem>>
    %52 = vector.broadcast %47 : i32 to vector<1x128xi32>
    %53 = arith.cmpi slt, %13, %52 : vector<1x128xi32>
    %54 = vector.broadcast %51 : i32 to vector<1x128xi32>
    %55 = arith.cmpi sge, %13, %54 : vector<1x128xi32>
    %56 = arith.ori %53, %55 : vector<1x128xi1>
    %57 = arith.andi %15, %56 : vector<1x128xi1>
    %c2_i32_14 = arith.constant 2 : i32
    %58 = arith.muli %arg0, %c2_i32_14 : i32
    %c1_i32_15 = arith.constant 1 : i32
    %59 = arith.addi %58, %c1_i32_15 : i32
    %60 = arith.index_cast %59 : i32 to index
    %61 = memref.load %arg4[%60] : memref<4xi32, #tpu.memory_space<smem>>
    %c2_i32_16 = arith.constant 2 : i32
    %62 = arith.muli %arg0, %c2_i32_16 : i32
    %c1_i32_17 = arith.constant 1 : i32
    %63 = arith.addi %62, %c1_i32_17 : i32
    %64 = arith.index_cast %63 : i32 to index
    %65 = memref.load %arg5[%64] : memref<4xi32, #tpu.memory_space<smem>>
    %66 = vector.broadcast %61 : i32 to vector<1x128xi32>
    %67 = arith.cmpi slt, %13, %66 : vector<1x128xi32>
    %68 = vector.broadcast %65 : i32 to vector<1x128xi32>
    %69 = arith.cmpi sge, %13, %68 : vector<1x128xi32>
    %70 = arith.ori %67, %69 : vector<1x128xi1>
    %71 = arith.andi %57, %70 : vector<1x128xi1>
    %72 = vector.broadcast %71 : vector<1x128xi1> to vector<4x128xi1>
    %73 = arith.andi %43, %72 : vector<4x128xi1>
    %74 = vector.shape_cast %73 : vector<4x128xi1> to vector<1x1x4x128xi1>
    %cst = arith.constant 0.000000e+00 : f32
    %75 = vector.broadcast %cst : f32 to vector<1x4x4x128xf32>
    %76 = vector.shape_cast %74 : vector<1x1x4x128xi1> to vector<1x1x4x128xi1>
    %77 = vector.broadcast %76 : vector<1x1x4x128xi1> to vector<1x4x4x128xi1>
    %78 = arith.select %77, %0, %75 : vector<1x4x4x128xi1>, vector<1x4x4x128xf32>
    %c0_18 = arith.constant 0 : index
    %c0_19 = arith.constant 0 : index
    %c0_20 = arith.constant 0 : index
    %c0_21 = arith.constant 0 : index
    %79 = vector.load %arg7[%c0_18, %c0_19, %c0_20, %c0_21] : memref<1x4x4x128xf32, #tpu.memory_space<vmem>>, vector<1x4x4x128xf32>
    tpu.vector_store %arg7[%c0_18, %c0_19, %c0_20, %c0_21], %78 {strides = array<i32>} : memref<1x4x4x128xf32, #tpu.memory_space<vmem>>, vector<1x4x4x128xf32>,
    return
  }
  func.func @transform_0(%arg0: i32, %arg1: i32, %arg2: memref<4xi32, #tpu.memory_space<smem>>, %arg3: memref<4xi32, #tpu.memory_space<smem>>, %arg4: memref<4xi32, #tpu.memory_space<smem>>, %arg5: memref<4xi32, #tpu.memory_space<smem>>) -> (i32, i32, i32, i32) {
    %c0_i32 = arith.constant 0 : i32
    %c0_i32_0 = arith.constant 0 : i32
    %c0_i32_1 = arith.constant 0 : i32
    return %arg0, %c0_i32, %arg1, %c0_i32_0 : i32, i32, i32, i32
  }
  func.func @transform_1(%arg0: i32, %arg1: i32, %arg2: memref<4xi32, #tpu.memory_space<smem>>, %arg3: memref<4xi32, #tpu.memory_space<smem>>, %arg4: memref<4xi32, #tpu.memory_space<smem>>, %arg5: memref<4xi32, #tpu.memory_space<smem>>) -> (i32, i32, i32, i32) {
    %c0_i32 = arith.constant 0 : i32
    %c0_i32_0 = arith.constant 0 : i32
    %c0_i32_1 = arith.constant 0 : i32
    return %arg0, %c0_i32, %arg1, %c0_i32_0 : i32, i32, i32, i32
  }
}

</mosaic_0001>

<bundles_post_ra>
// kernel: tpu_custom_call.1
= control target key start
LH: loop header
LB: loop body
LE: loop exit
PB: predicated region body
PF: predicated region fallthrough
CT: control target
= control target key end

     0   :  { %s832_s0 = inlined_call_operand.vmem [shape: s32[4], index: 0, kind: input, shape index: {}]   ;;  %s833_s4 = inlined_call_operand.hbm [shape: f32[2,4,4,128], index: 4, kind: input, shape index: {}, may-alias: {4,5}]   ;;  %s834_s5 = inlined_call_operand.hbm [shape: f32[2,4,4,128], index: 5, kind: output, shape index: {}, may-alias: {4,5}]   ;;  %s835_s1 = inlined_call_operand.vmem [shape: s32[4], index: 1, kind: input, shape index: {}]   ;;  %s836_s2 = inlined_call_operand.vmem [shape: s32[4], index: 2, kind: input, shape index: {}]   ;;  %s837_s3 = inlined_call_operand.vmem [shape: s32[4], index: 3, kind: input, shape index: {}]  }
   0x1   :  { %s10_s20 = sshll.u32 %s832_s0, 4  ;;  %s14_s23 = sshll.u32 %s835_s1, 4  ;;  %s11_s20 = int_to_ptr.vmem [resolvable:$true] %s10_s20  ;;  %s15_s23 = int_to_ptr.vmem [resolvable:$true] %s14_s23 }
   0x2   :  { %s422_s24 = scalar_lea.vmem %s11_s20, 16  ;;  %p427_p1 = scmp.lt.s32.totalorder %s11_s20, %s11_s20 }
   0x3   :  { %p423_p0 = scmp.ne.s32.totalorder %s11_s20, %s422_s24  ;;  %p428_p2 = scmp.lt.s32.totalorder %s422_s24, %s422_s24 }
   0x5   :  { %p429_p3 = por %p428_p2, %p427_p1 }
   0x7   :  { %p430_p4 = pnand %p429_p3, %p423_p0 }
   0x9   :  { %433 = shalt.err (!%p430_p4)  }
   0xa   :  { %s582_s25 = smov [#allocation3]   ;;  %s434_s26 = scalar_lea.vmem %s15_s23, 16 }
   0xb   :  { %13 = dma.vmem_to_smem %s11_s20, 16, %s582_s25, [#allocation2] }
   0xc   :  { %p435_p5 = scmp.ne.s32.totalorder %s15_s23, %s434_s26  ;;  %p439_p6 = scmp.lt.s32.totalorder %s15_s23, %s15_s23 }
   0xd   :  { %p440_p7 = scmp.lt.s32.totalorder %s434_s26, %s434_s26 }
   0xf   :  { %p441_p8 = por %p440_p7, %p439_p6 }
  0x11   :  { %p442_p9 = pnand %p441_p8, %p435_p5 }
  0x13   :  { %445 = shalt.err (!%p442_p9)  }
  0x14   :  { %s583_s0 = smov [#allocation4]   ;;  %s18_s28 = sshll.u32 %s836_s2, 4  ;;  %s19_s28 = int_to_ptr.vmem [resolvable:$true] %s18_s28 }
  0x15   :  { %17 = dma.vmem_to_smem %s15_s23, 16, %s583_s0, [#allocation2] }
  0x16   :  { %s22_s6 = sshll.u32 %s837_s3, 4  ;;  %s446_s7 = scalar_lea.vmem %s19_s28, 16  ;;  %s23_s6 = int_to_ptr.vmem [resolvable:$true] %s22_s6 }
  0x17   :  { %p447_p10 = scmp.ne.s32.totalorder %s19_s28, %s446_s7  ;;  %p451_p11 = scmp.lt.s32.totalorder %s19_s28, %s19_s28 }
  0x18   :  { %p452_p12 = scmp.lt.s32.totalorder %s446_s7, %s446_s7 }
  0x1a   :  { %p453_p13 = por %p452_p12, %p451_p11 }
  0x1c   :  { %p454_p0 = pnand %p453_p13, %p447_p10 }
  0x1e   :  { %457 = shalt.err (!%p454_p0)  }
  0x1f   :  { %s584_s8 = smov [#allocation5]   ;;  %s458_s9 = scalar_lea.vmem %s23_s6, 16 }
  0x20   :  { %21 = dma.vmem_to_smem %s19_s28, 16, %s584_s8, [#allocation2] }
  0x21   :  { %p459_p1 = scmp.ne.s32.totalorder %s23_s6, %s458_s9  ;;  %p463_p2 = scmp.lt.s32.totalorder %s23_s6, %s23_s6 }
  0x22   :  { %p464_p3 = scmp.lt.s32.totalorder %s458_s9, %s458_s9 }
  0x24   :  { %p465_p4 = por %p464_p3, %p463_p2 }
  0x26   :  { %p466_p5 = pnand %p465_p4, %p459_p1 }
  0x28   :  { %469 = shalt.err (!%p466_p5)  }
  0x29   :  { %s585_s2 = smov [#allocation6]  }
  0x2a   :  { %25 = dma.vmem_to_smem %s23_s6, 16, %s585_s2, [#allocation2] }
  0x2b   :  { %548 = dma.done.wait [#allocation2], 64 }
  0x2c   :  { %549 = vsyncadd [#allocation2], 4294967232 }
  0x2d   :  { %27 = sfence }
  0x2e   :  { %28 = vsyncpa [#allocation8], 0 }
  0x2f   :  { %30 = vsyncpa [#allocation8 + $0x1], 0 }
  0x30   :  { %31 = vsyncpa [#allocation9], 0 }
  0x31   :  { %33 = vsyncpa [#allocation9 + $0x1], 0  ;;  %s634_s3 = smov 0   ;;  %s636_s10 = smov 0  }
  0x32   :  { %s638_s11 = smov 0   ;;  %s640_s12 = smov 0  }
  0x33   :  { %s642_s13 = smov 0   ;;  %s644_s14 = smov 0  }
  0x34 LB: > { %s334_s15 = sadd.s32 4294967295, %s580_s14   ;;  %s335_s16 = sadd.s32 4294967294, %s580_s14   ;;  %s580_s14 = sphi %s644_s14, %s39_s14   ;;  %s576_s13 = sphi %s642_s13, %s860_s13   ;;  %s572_s12 = sphi %s640_s12, %s859_s12   ;;  %s568_s11 = sphi %s638_s11, %s858_s11   ;;  %s564_s10 = sphi %s636_s10, %s857_s10   ;;  %s560_s3 = sphi %s634_s3, %s856_s3  }
  0x35   : > { %s51_s17 = sadd.s32 1, %s576_s13  ;;  %s60_s18 = sadd.s32 1, %s568_s11 }
  0x36   : > { %p53_p6 = scmp.ge.s32.totalorder %s51_s17, 2  ;;  %p67_p7 = scmp.ne.s32.totalorder %s568_s11, %s564_s10 }
  0x37   : > { %p68_p8 = scmp.eq.s32.totalorder %s580_s14, 0  ;;  %p73_p9 = scmp.ne.s32.totalorder %s564_s10, %s560_s3 }
  0x38   : > { %s862_s17 = smov (%p53_p6, %s51_s17), 0  ;;  %p74_p11 = scmp.eq.s32.totalorder %s334_s15, 0 }
  0x39   : > { %p675_p10 = por %p68_p8, %p67_p7  ;;  %s55_s20 = ssub.s32 %s576_s13, %s862_s17 }
  0x3a   : > { %p99_p12 = scmp.eq.s32.totalorder %s334_s15, 1  ;;  %p58_p13 = scmp.eq.s32.totalorder %s55_s20, 0 }
  0x3b   : > { %p681_p0 = por %p74_p11, %p73_p9  ;;  %p105_p2 = scmp.eq.s32.totalorder %s335_s16, 1 }
  0x3c   : > { %p685_p1 = por %p99_p12, %p67_p7  ;;  %p364_p5 = scmp.lt.s32.totalorder %s580_s14, 2 }
  0x3d   : > { %s690_s23 = scalar_select %p58_p13, %s568_s11, %s60_s18  }
  0x3e   : > { %p692_p3 = por %p105_p2, %p73_p9  ;;  %s125_s25 = sand.u32 1, %s568_s11  }
  0x3f   : > { %s338_s26 = sshll.u32 %s125_s25, 4  ;;  %s350_s0 = sshll.u32 %s576_s13, 8 }
  0x40   : > { %s136_s28 = scalar_lea.hbm %s833_s4, %s350_s0  ;;  %s129_s29 = scalar_lea.vmem [#allocation7], %s338_s26 }
  0x41   : > { %s137_s30 = sshll.u32 %s129_s29, 4  ;;  %p705_p6 = pnand %p364_p5, %p675_p10  ;;  %s138_s30 = int_to_ptr.vmem [resolvable:$true] %s137_s30 }
  0x42   : > { %p341_p7 = scmp.ge.s32.totalorder %s580_s14, 1  ;;  %s126_s7 = scalar_lea.sflag [#allocation8], %s125_s25 }
  0x43   : > { %p472_p8 = pneg %p705_p6  ;;  %s483_s8 = scalar_lea.vmem %s138_s30, 256 }
  0x44   : > { %p484_p9 = scmp.ne.s32.totalorder %s138_s30, %s483_s8  ;;  %s586_s9 = smov [#allocation7]  }
  0x45   : > { %s488_s2 = sshll.u32 %s586_s9, 4  ;;  %s489_s2 = int_to_ptr.vmem [resolvable:$false] %s488_s2 }
  0x46   : > { %p486_p11 = pnand %p484_p9, %p472_p8  ;;  %s490_s15 = scalar_lea.vmem %s489_s2, 512 }
  0x47   : > { %p491_p13 = scmp.lt.s32.totalorder %s138_s30, %s489_s2  ;;  %p492_p2 = scmp.lt.s32.totalorder %s490_s15, %s483_s8 }
  0x48   : > { %p487_p12 = pneg %p486_p11 }
  0x49   : > { %p493_p4 = por %p492_p2, %p491_p13 }
  0x4b   : > { %p494_p10 = pnand %p493_p4, %p487_p12 }
  0x4d   : > { %497 = shalt.err (!%p494_p10)
}
  0x4e   : > { %s587_s16 = smov 64   ;;  %s588_s18 = smov 4  }
  0x4f   : > { %359 = dma.hbm_to_vmem [thread:$0]  (!%p705_p6), %s136_s28, 256, %s138_s30, %s126_s7, %s587_s16, %s587_s16, %s588_s18  }
  0x50   : > { %p145_p5 = scmp.lt.s32.totalorder %s580_s14, 3 }
  0x52   : > { %p146_p8 = pnand %p341_p7, %p145_p5 }
  0x53   : > { %s718_s19 = sand.u32 (!%p146_p8), 1, %s564_s10  }
  0x54   : > { %149 = sbr.rel (%p146_p8) target bundleno = 125 (0x7d), region = 24  ;;  %s342_s20 = sshll.u32 (!%p146_p8), %s718_s19, 4 }
  0x55   : > { %s152_s25 = scalar_lea.sflag (!%p146_p8), [#allocation8], %s718_s19  ;;  %s724_s26 = scalar_lea.vmem (!%p146_p8), [#allocation7], %s342_s20 }
  0x59   : > { %551 = dma.done.wait (%p681_p0), %s152_s25, 256  }
  0x5a   : > { %553 = vsyncadd (%p681_p0), %s152_s25, 4294967040  ;;  %v179_v0 = vlaneseq  ;;  %s344_s0 = sshll.u32 %s572_s12, 1  ;;  %s173_s9 = scalar_lea.vmem [#allocation10], %s342_s20  ;;  %v174_v21 = vld [vmem:[%s724_s26] sm:$0xf] }
  0x5b   : > { %s190_s1 = sld [smem:[#allocation3 + %s344_s0]]  ;;  %s197_s27 = sadd.s32 1, %s344_s0  ;;  %v175_v22 = vld [vmem:[%s724_s26 + $0x4] sm:$0xf]  ;;  %v176_v23 = vld [vmem:[%s724_s26 + $0x8] sm:$0xf] }
  0x5c   : > { %v180_v1 = vshrl.u32 %v179_v0, 7  ;;  %v182_v2 = vand.u32 127, %v179_v0  ;;  %s191_s28 = sld [smem:[#allocation4 + %s344_s0]]  ;;  %s249_s2 = sshll.u32 %s173_s9, 4  ;;  %v177_v24 = vld [vmem:[%s724_s26 + $0xc] sm:$0xf]  ;;  %s777_s2 = int_to_ptr.vmem [resolvable:$true] %s249_s2 }
  0x5d   : > { %s198_s29 = sld [smem:[#allocation3 + %s197_s27]]  ;;  %s351_s15 = sshll.u32 %s572_s12, 8 }
  0x5e   : > { %v185_v3 = vmul.u32 8, %v180_v1  ;;  %v186_v4 = vshra.s32 %v182_v2, 4  ;;  %s199_s30 = sld [smem:[#allocation4 + %s197_s27]]  ;;  %v188_v7 = vand.u32 15, %v182_v2  ;;  %s784_s18 = scalar_lea.hbm %s834_s5, %s351_s15 }
  0x5f   : > { %s206_s6 = sld [smem:[#allocation5 + %s344_s0]]  ;;  %s235_s20 = scalar_lea.sflag [#allocation9], %s718_s19 }
  0x60   : > { %v187_v5 = vadd.s32 %v186_v4, %v185_v3  ;;  %s207_s7 = sld [smem:[#allocation6 + %s344_s0]]  ;;  %s498_s25 = scalar_lea.vmem %s777_s2, 256 }
  0x61   : > { %v192_v6 = vstv %s190_s1  ;;  %s213_s8 = sld [smem:[#allocation5 + %s197_s27]]  ;;  %p499_p0 = scmp.ne.s32.totalorder %s777_s2, %s498_s25 }
  0x62   : > { %vm731_vm0 = vcmp.lt.s32.totalorder %v187_v5, %v192_v6  ;;  %v194_v9 = vstv %s191_s28  ;;  %s214_s21 = sld [smem:[#allocation6 + %s197_s27]]  ;;  %s589_s26 = smov [#allocation10]  }
  0x63   : > { %vm735_vm1 = vcmp.ge.s32.totalorder %v187_v5, %v194_v9  ;;  %v200_v11 = vstv %s198_s29  ;;  %p500_p4 = pnand %p499_p0, %p685_p1  ;;  %s502_s0 = sshll.u32 %s589_s26, 4  ;;  %s503_s0 = int_to_ptr.vmem [resolvable:$false] %s502_s0 }
  0x64   : > { %vm739_vm2 = vcmp.lt.s32.totalorder %v187_v5, %v200_v11  ;;  %v202_v13 = vstv %s199_s30  ;;  %vm196_vm3 = vmor %vm731_vm0, %vm735_vm1  ;;  %s504_s1 = scalar_lea.vmem %s503_s0, 512  ;;  %p505_p7 = scmp.lt.s32.totalorder %s777_s2, %s503_s0 }
  0x65   : > { %vm747_vm4 = vcmp.ge.s32.totalorder %v187_v5, %v202_v13  ;;  %v208_v15 = vstv %s206_s6  ;;  %p501_p6 = pneg %p500_p4  ;;  %p506_p9 = scmp.lt.s32.totalorder %s504_s1, %s498_s25 }
  0x66   : > { %vm204_vm5 = vmor %vm739_vm2, %vm747_vm4  ;;  %vm755_vm6 = vcmp.lt.s32.totalorder %v188_v7, %v208_v15  ;;  %v210_v17 = vstv %s207_s7 }
  0x67   : > { %vm759_vm7 = vcmp.ge.s32.totalorder %v188_v7, %v210_v17  ;;  %v215_v19 = vstv %s213_s8  ;;  %vm205_vm10 = vmand %vm196_vm3, %vm204_vm5  ;;  %p507_p11 = por %p506_p9, %p505_p7 }
  0x68   : > { %vm212_vm8 = vmor %vm755_vm6, %vm759_vm7  ;;  %vm216_vm9 = vcmp.lt.s32.totalorder %v188_v7, %v215_v19  ;;  %v217_v20 = vstv %s214_s21 }
  0x69   : > { %vm218_vm11 = vcmp.ge.s32.totalorder %v188_v7, %v217_v20  ;;  %p508_p12 = pnand %p507_p11, %p501_p6 }
  0x6a   : > { %vm219_vm12 = vmor %vm216_vm9, %vm218_vm11 }
  0x6b   : > { %vm220_vm13 = vmand %vm212_vm8, %vm219_vm12 }
  0x6c   : > { %vm223_vm14 = vmand %vm205_vm10, %vm220_vm13 }
  0x6d   : > { %v226_v25 = vsel %vm223_vm14, %v174_v21, 0.0  ;;  %v227_v26 = vsel %vm223_vm14, %v175_v22, 0.0  ;;  %v228_v27 = vsel %vm223_vm14, %v176_v23, 0.0  ;;  %v229_v28 = vsel %vm223_vm14, %v177_v24, 0.0 }
  0x6e   : > { %230 = vst [vmem:[%s173_s9] sm:$0xf] %v226_v25  ;;  %231 = vst [vmem:[%s173_s9 + $0x4] sm:$0xf] %v227_v26 }
  0x6f   : > { %232 = vst [vmem:[%s173_s9 + $0x8] sm:$0xf] %v228_v27  ;;  %233 = vst [vmem:[%s173_s9 + $0xc] sm:$0xf] %v229_v28 }
  0x70   : > { %511 = shalt.err (!%p508_p12)
}
  0x71   : > { %s512_s27 = scalar_lea.hbm %s784_s18, 256  ;;  %s516_s30 = scalar_lea.hbm %s834_s5, 512 }
  0x72   : > { %p513_p13 = scmp.ne.s32.totalorder %s784_s18, %s512_s27  ;;  %p517_p5 = scmp.lt.s32.totalorder %s784_s18, %s834_s5 }
  0x73   : > { %p518_p8 = scmp.lt.s32.totalorder %s516_s30, %s512_s27 }
  0x74   : > { %p514_p2 = pnand %p513_p13, %p685_p1 }
  0x75   : > { %p519_p0 = por %p518_p8, %p517_p5 }
  0x76   : > { %p515_p10 = pneg %p514_p2 }
  0x78   : > { %p520_p4 = pnand %p519_p0, %p515_p10 }
  0x7a   : > { %523 = shalt.err (!%p520_p4)
}
  0x7b   : > { %s590_s8 = smov 64   ;;  %s591_s21 = smov 4  }
  0x7c   : > { %354 = dma.vmem_to_hbm [thread:$0]  (%p685_p1), %s777_s2, 256, %s784_s18, %s235_s20, %s590_s8, %s590_s8, %s591_s21  }
  0x7d PF: > { %s264_s9 = sand.u32 1, %s560_s3   ;;  %p855_p6 = scmp.ge.s32.totalorder %s580_s14, 2 }
  0x7e   : > { %s265_s15 = scalar_lea.sflag [#allocation9], %s264_s9 }
  0x7f   : > { %p361_p7 = pnand %p855_p6, %p692_p3 }
  0x81   : > { %p362_p9 = pneg %p361_p7 }
  0x83   : > { %555 = dma.done.wait (%p362_p9), %s265_s15, 256  }
  0x84   : > { %557 = vsyncadd (%p362_p9), %s265_s15, 4294967040  ;;  %s39_s14 = sadd.s32 1, %s580_s14   ;;  %s856_s3 = smov %s564_s10 }
  0x85   : > { %p36_p11 = scmp.ge.s32.totalorder %s39_s14, 4   ;;  %s857_s10 = smov %s568_s11 }
  0x86   : > { %s858_s11 = smov %s690_s23  ;;  %s859_s12 = smov %s576_s13 }
  0x87   : > { %s860_s13 = smov %s862_s17  ;;  %38 = sbr.rel (!%p36_p11) target bundleno = 52 (0x34), region = 69 }
  0x8c   :  { %270 = vsyncpa [#allocation8], 1 }
  0x8d   :  { %272 = vsyncpa [#allocation8 + $0x1], 1 }
  0x8e   :  { %273 = vsyncpa [#allocation9], 1 }
  0x8f   :  { %275 = vsyncpa [#allocation9 + $0x1], 1 }

</bundles_post_ra>
